<compile_context>
chip_gen: v7x
topology: tpu7x:2x2x1
jax: 0.10.0
libtpu: 0.0.40
codegen_flags: <defaults>
</compile_context>

<pallas_src>
import jax
import jax.numpy as jnp
from jax.experimental import pallas as pl
from jax.experimental.pallas import tpu as pltpu

_LANES = 128
_TARGET_TILE_BYTES = 4 << 20      # ~4 MiB VMEM per output block (8 MiB double-buffered)
_MIN_GRID_BLOCKS = 4              # >= 2 blocks per TensorCore on v7x
_SMALL_BYPASS_BYTES = 128 << 10   # below this, launch overhead dwarfs the store time


def _ceil_div(a: int, b: int) -> int:
    return -(-a // b)


def _noenv_fill_kernel(zeros_ref, o_ref):
    # zeros_ref: (1,) f32 scalar in SMEM (scalar prefetch).
    # o_ref:     (tile_r, width) f32 output tile in VMEM.
    o_ref[...] = jnp.full(o_ref.shape, zeros_ref[0], dtype=o_ref.dtype)


def _fill_2d(zeros: jax.Array, rows: int, width: int) -> jax.Array:
    """Fill an exact (rows, width) f32 array with zeros[0] via a Pallas kernel."""
    # VMEM footprint per row (lanes pad to 128 in VMEM even if width < 128).
    padded_width = _ceil_div(width, _LANES) * _LANES
    vmem_row_bytes = padded_width * 4

    # Largest row-tile that fits the VMEM target (multiple of 8 rows).
    max_tile_r = max(8, (_TARGET_TILE_BYTES // vmem_row_bytes) // 8 * 8)
    # But keep >= _MIN_GRID_BLOCKS blocks when there is enough data (v7x megacore).
    want_tile_r = max(8, _ceil_div(rows, _MIN_GRID_BLOCKS) // 8 * 8)
    tile_r = min(max_tile_r, want_tile_r)
    if tile_r >= rows:
        tile_r = rows               # single full-extent block (any row count is legal)
    grid = (_ceil_div(rows, tile_r),)   # ragged edge block (if any) handled by Pallas

    return pl.pallas_call(
        _noenv_fill_kernel,
        out_shape=jax.ShapeDtypeStruct((rows, width), jnp.float32),
        grid_spec=pltpu.PrefetchScalarGridSpec(
            num_scalar_prefetch=1,   # `zeros` -> SMEM
            grid=grid,
            in_specs=[],             # no VMEM inputs
            out_specs=pl.BlockSpec((tile_r, width), lambda i, z: (i, 0)),
        ),
        compiler_params=pltpu.CompilerParams(
            dimension_semantics=("parallel",),   # shard row-blocks across TCs (v7x)
        ),
        cost_estimate=pl.CostEstimate(
            flops=0,
            transcendentals=0,
            bytes_accessed=rows * width * 4,     # exact logical output bytes
        ),
    )(zeros)


class NoEnvEmbedding:
    """JAX/Pallas port of the PyTorch NoEnvEmbedding module."""

    def __init__(self, emb_size: int):
        self.emb_size = int(emb_size)
        # nn.Parameter(torch.tensor(0.0), requires_grad=False) -> frozen scalar,
        # kept as a (1,) f32 array so it can be scalar-prefetched into SMEM.
        self.zeros = jnp.zeros((1,), dtype=jnp.float32)

    def __call__(self, sketchs: jax.Array, sketch_lengths: jax.Array) -> jax.Array:
        # sketch_lengths is intentionally unused (matches the reference module).
        del sketch_lengths
        out_shape = tuple(sketchs.shape[:-1]) + (self.emb_size,)

        total = 1
        for d in out_shape:
            total *= d

        if total == 0:
            # Zero-size output: nothing to fill (avoids rows=0 / tile_r=0).
            return jnp.zeros(out_shape, dtype=jnp.float32)

        if total * 4 < _SMALL_BYPASS_BYTES:
            # Tiny output: kernel launch + grid overhead dominates; let XLA fuse.
            return jnp.full(out_shape, self.zeros[0], dtype=jnp.float32)

        # Pick an exact-size, lane-dense 2D layout (no pad, no post-slice, so the
        # final reshape is a contiguity-preserving metadata op — no extra HBM copy).
        if self.emb_size % _LANES == 0:
            width = self.emb_size        # native layout already lane-dense
        elif total % _LANES == 0:
            width = _LANES               # 128-wide slab; bitcast-reshape afterwards
        else:
            width = self.emb_size        # exact layout; masked lanes but zero glue
        rows = total // width

        out2d = _fill_2d(self.zeros, rows, width)
        return out2d.reshape(out_shape)


if __name__ == "__main__":
    key = jax.random.PRNGKey(0)
    k1, k2, k3, k4 = jax.random.split(key, 4)

    # Case 1: spec-sized tiny input (2, 8, 16) -> (2, 8, 32); small-output fast path.
    m_small = NoEnvEmbedding(32)
    sk1 = jax.random.normal(k1, (2, 8, 16), dtype=jnp.float32)
    len1 = jax.random.randint(k2, (2,), 1, 9, dtype=jnp.int32)
    out1 = jax.block_until_ready(m_small(sk1, len1))
    assert out1.shape == (2, 8, 32) and out1.dtype == jnp.float32
    assert bool(jnp.all(out1 == 0.0))

    # Case 2: emb_size % 128 == 0 -> native lane-dense layout via the Pallas kernel.
    m128 = NoEnvEmbedding(128)
    sk2 = jax.random.normal(k3, (4, 256, 16), dtype=jnp.float32)
    len2 = jnp.full((4,), 256, dtype=jnp.int32)
    out2 = jax.block_until_ready(m128(sk2, len2))
    assert out2.shape == (4, 256, 128) and out2.dtype == jnp.float32
    assert bool(jnp.all(out2 == 0.0))

    # Case 3: emb_size % 128 != 0 but total % 128 == 0 -> 128-wide slab kernel path.
    m96 = NoEnvEmbedding(96)
    sk3 = jax.random.normal(k4, (2, 512, 8), dtype=jnp.float32)
    len3 = jnp.full((2,), 512, dtype=jnp.int32)
    out3 = jax.block_until_ready(m96(sk3, len3))
    assert out3.shape == (2, 512, 96) and out3.dtype == jnp.float32
    assert bool(jnp.all(out3 == 0.0))

    # Case 4: neither divisible by 128 -> exact (rows, emb_size) kernel path.
    m33 = NoEnvEmbedding(33)
    sk4 = jax.random.normal(k1, (5, 999, 4), dtype=jnp.float32)
    len4 = jnp.full((5,), 999, dtype=jnp.int32)
    out4 = jax.block_until_ready(m33(sk4, len4))
    assert out4.shape == (5, 999, 33) and out4.dtype == jnp.float32
    assert bool(jnp.all(out4 == 0.0))

    print("KERNEL_OK")
</pallas_src>

<mosaic_0001>
module attributes {stable_mosaic.version = 11 : i64} {
  func.func @_noenv_fill_kernel(%arg0: i32, %arg1: memref<1xf32, #tpu.memory_space<smem>>, %arg2: memref<256x128xf32, #tpu.memory_space<vmem>>) attributes {dimension_semantics = [#tpu.dimension_semantics<parallel>], iteration_bounds = array<i64: 4>, scalar_prefetch = 1 : i64, scratch_operands = 0 : i64, tpu.core_type = #tpu.core_type<tc>, window_params = [{transform_indices = @transform_0, window_bounds = array<i64: 256, 128>}]} {
    %c0 = arith.constant 0 : index
    %0 = memref.load %arg1[%c0] : memref<1xf32, #tpu.memory_space<smem>>
    %1 = vector.broadcast %0 : f32 to vector<256x128xf32>
    %c0_0 = arith.constant 0 : index
    %c0_1 = arith.constant 0 : index
    %2 = vector.load %arg2[%c0_0, %c0_1] : memref<256x128xf32, #tpu.memory_space<vmem>>, vector<256x128xf32>
    tpu.vector_store %arg2[%c0_0, %c0_1], %1 {strides = array<i32>} : memref<256x128xf32, #tpu.memory_space<vmem>>, vector<256x128xf32>,
    return
  }
  func.func @transform_0(%arg0: i32, %arg1: memref<1xf32, #tpu.memory_space<smem>>) -> (i32, i32) {
    %c0_i32 = arith.constant 0 : i32
    %c0_i32_0 = arith.constant 0 : i32
    return %arg0, %c0_i32 : i32, i32
  }
}

</mosaic_0001>

<bundles_post_ra>
// kernel: tpu_custom_call.1
= control target key start
LH: loop header
LB: loop body
LE: loop exit
PB: predicated region body
PF: predicated region fallthrough
CT: control target
= control target key end

     0   :  { %s381_s0 = inlined_call_operand.<no memory space> [shape: f32[1], index: 0, kind: input, shape index: {}]   ;;  %s382_s1 = inlined_call_operand.hbm [shape: f32[1024,128], index: 1, kind: output, shape index: {}]  }
   0x1   :  { %6 = sst [smem:[#allocation3]] %s381_s0 }
   0x2   :  { %7 = vsyncpa [#allocation5], 0 }
   0x3   :  { %9 = vsyncpa [#allocation5 + $0x1], 0  ;;  %s258_s8 = smov 0   ;;  %s260_s9 = smov 0  }
   0x4   :  { %s262_s10 = smov 0  }
   0x5 LB: > { %s143_s0 = sadd.s32 4294967295, %s240_s10   ;;  %s275_s11 = sadd.s32 1, %s240_s10   ;;  %s240_s10 = sphi %s262_s10, %s387_s10   ;;  %s236_s9 = sphi %s260_s9, %s386_s9   ;;  %s232_s8 = sphi %s258_s8, %s385_s8  }
   0x6   : > { %s18_s12 = ssub.s32 %s240_s10, %s275_s11  ;;  %s21_s13 = sadd.s32 1, %s236_s9 }
   0x7   : > { %p19_p0 = scmp.eq.s32.totalorder %s18_s12, 0  ;;  %p144_p1 = scmp.ne.s32.totalorder %s18_s12, 0 }
   0x8   : > { %p25_p2 = scmp.eq.s32.totalorder %s240_s10, 3  ;;  %p30_p3 = scmp.ne.s32.totalorder %s236_s9, %s232_s8 }
   0x9   : > { %s284_s14 = scalar_select %p19_p0, %s236_s9, %s21_s13  }
   0xa   : > { %p286_p4 = por %p144_p1, %p25_p2  ;;  %p31_p5 = scmp.eq.s32.totalorder %s143_s0, 3 }
   0xb   : > { %p145_p7 = scmp.ge.s32.totalorder %s240_s10, 4 }
   0xc   : > { %p290_p6 = por %p31_p5, %p30_p3  ;;  %s45_s17 = sand.u32 (!%p145_p7), 1, %s236_s9  }
   0xd   : > { %40 = sbr.rel (%p145_p7) target bundleno = 50 (0x32), region = 12  ;;  %s49_s18 = sld [smem:[#allocation3]] (!%p145_p7) }
   0xe   : > { %s146_s19 = sshll.u32 (!%p145_p7), %s45_s17, 8  ;;  %s152_s20 = sshll.u32 (!%p145_p7), %s240_s10, 12 }
   0xf   : > { %s299_s21 = scalar_lea.vmem (!%p145_p7), [#allocation4], %s146_s19  ;;  %s305_s25 = scalar_lea.hbm (!%p145_p7), %s382_s1, %s152_s20 }
  0x10   : > { %s97_s22 = sshll.u32 (!%p145_p7), %s299_s21, 4  ;;  %s343_s26 = scalar_lea.sflag (!%p145_p7), [#allocation5], %s45_s17  ;;  %s307_s22 = int_to_ptr.vmem [resolvable:$true] %s97_s22 }
  0x11   : > { %s186_s27 = scalar_lea.vmem (!%p145_p7), %s307_s22, 4096  ;;  %s242_s28 = smov (!%p145_p7), [#allocation4]  }
  0x12   : > { %p187_p8 = scmp.ne.s32.totalorder (!%p145_p7), %s307_s22, %s186_s27  ;;  %s190_s29 = sshll.u32 (!%p145_p7), %s242_s28, 4  ;;  %s191_s29 = int_to_ptr.vmem [resolvable:$false] %s190_s29 }
  0x13   : > { %v50_v0 = vstv (!%p145_p7), %s49_s18  ;;  %s192_s30 = scalar_lea.vmem (!%p145_p7), %s191_s29, 8192  ;;  %p193_p11 = scmp.lt.s32.totalorder (!%p145_p7), %s307_s22, %s191_s29 }
  0x14   : > { %51 = vst [vmem:[%s299_s21] sm:$0xff] %v50_v0  ;;  %52 = vst [vmem:[%s299_s21 + $0x8] sm:$0xff] %v50_v0  ;;  %p188_p9 = pnand %p187_p8, %p286_p4  ;;  %p194_p12 = scmp.lt.s32.totalorder %s192_s30, %s186_s27 }
  0x15   : > { %53 = vst [vmem:[%s299_s21 + $0x10] sm:$0xff] %v50_v0  ;;  %54 = vst [vmem:[%s299_s21 + $0x18] sm:$0xff] %v50_v0 }
  0x16   : > { %55 = vst [vmem:[%s299_s21 + $0x20] sm:$0xff] %v50_v0  ;;  %56 = vst [vmem:[%s299_s21 + $0x28] sm:$0xff] %v50_v0  ;;  %p189_p10 = pneg %p188_p9  ;;  %p195_p13 = por %p194_p12, %p193_p11 }
  0x17   : > { %57 = vst [vmem:[%s299_s21 + $0x30] sm:$0xff] %v50_v0  ;;  %58 = vst [vmem:[%s299_s21 + $0x38] sm:$0xff] %v50_v0 }
  0x18   : > { %59 = vst [vmem:[%s299_s21 + $0x40] sm:$0xff] %v50_v0  ;;  %60 = vst [vmem:[%s299_s21 + $0x48] sm:$0xff] %v50_v0  ;;  %p196_p0 = pnand %p195_p13, %p189_p10 }
  0x19   : > { %61 = vst [vmem:[%s299_s21 + $0x50] sm:$0xff] %v50_v0  ;;  %62 = vst [vmem:[%s299_s21 + $0x58] sm:$0xff] %v50_v0 }
  0x1a   : > { %63 = vst [vmem:[%s299_s21 + $0x60] sm:$0xff] %v50_v0  ;;  %64 = vst [vmem:[%s299_s21 + $0x68] sm:$0xff] %v50_v0 }
  0x1b   : > { %65 = vst [vmem:[%s299_s21 + $0x70] sm:$0xff] %v50_v0  ;;  %66 = vst [vmem:[%s299_s21 + $0x78] sm:$0xff] %v50_v0 }
  0x1c   : > { %67 = vst [vmem:[%s299_s21 + $0x80] sm:$0xff] %v50_v0  ;;  %68 = vst [vmem:[%s299_s21 + $0x88] sm:$0xff] %v50_v0 }
  0x1d   : > { %69 = vst [vmem:[%s299_s21 + $0x90] sm:$0xff] %v50_v0  ;;  %70 = vst [vmem:[%s299_s21 + $0x98] sm:$0xff] %v50_v0 }
  0x1e   : > { %71 = vst [vmem:[%s299_s21 + $0xa0] sm:$0xff] %v50_v0  ;;  %72 = vst [vmem:[%s299_s21 + $0xa8] sm:$0xff] %v50_v0 }
  0x1f   : > { %73 = vst [vmem:[%s299_s21 + $0xb0] sm:$0xff] %v50_v0  ;;  %74 = vst [vmem:[%s299_s21 + $0xb8] sm:$0xff] %v50_v0 }
  0x20   : > { %75 = vst [vmem:[%s299_s21 + $0xc0] sm:$0xff] %v50_v0  ;;  %76 = vst [vmem:[%s299_s21 + $0xc8] sm:$0xff] %v50_v0 }
  0x21   : > { %77 = vst [vmem:[%s299_s21 + $0xd0] sm:$0xff] %v50_v0  ;;  %78 = vst [vmem:[%s299_s21 + $0xd8] sm:$0xff] %v50_v0 }
  0x22   : > { %79 = vst [vmem:[%s299_s21 + $0xe0] sm:$0xff] %v50_v0  ;;  %80 = vst [vmem:[%s299_s21 + $0xe8] sm:$0xff] %v50_v0 }
  0x23   : > { %81 = vst [vmem:[%s299_s21 + $0xf0] sm:$0xff] %v50_v0  ;;  %82 = vst [vmem:[%s299_s21 + $0xf8] sm:$0xff] %v50_v0 }
  0x24   : > { %199 = shalt.err (!%p196_p0)
}
  0x25   : > { %s200_s2 = scalar_lea.hbm %s305_s25, 4096  ;;  %s204_s5 = scalar_lea.hbm %s382_s1, 16384 }
  0x26   : > { %p201_p1 = scmp.ne.s32.totalorder %s305_s25, %s200_s2  ;;  %p205_p5 = scmp.lt.u32.totalorder %s305_s25, %s382_s1 }
  0x27   : > { %p206_p7 = scmp.lt.u32.totalorder %s204_s5, %s200_s2  ;;  %p208_p9 = scmp.lt.u32.totalorder %s200_s2, %s305_s25 }
  0x28   : > { %p202_p2 = pnand %p201_p1, %p286_p4 }
  0x29   : > { %p207_p8 = por %p206_p7, %p205_p5 }
  0x2a   : > { %p203_p3 = pneg %p202_p2 }
  0x2b   : > { %p209_p10 = por %p208_p9, %p207_p8 }
  0x2d   : > { %p210_p11 = pnand %p209_p10, %p203_p3 }
  0x2f   : > { %213 = shalt.err (!%p210_p11)
}
  0x30   : > { %s243_s0 = smov 128   ;;  %s244_s12 = smov 8  }
  0x31   : > { %153 = dma.vmem_to_hbm [thread:$0]  (%p286_p4), %s307_s22, 4096, %s305_s25, %s343_s26, %s243_s0, %s243_s0, %s244_s12  }
  0x32 PF: > { %p159_p12 = scmp.ge.s32.totalorder %s240_s10, 1  ;;  %s112_s13 = sand.u32 1, %s232_s8  }
  0x33   : > { %s113_s17 = scalar_lea.sflag [#allocation5], %s112_s13 }
  0x34   : > { %p156_p13 = pnand %p159_p12, %p290_p6 }
  0x36   : > { %227 = dma.done.wait (!%p156_p13), %s113_s17, 4096  }
  0x37   : > { %229 = vsyncadd (!%p156_p13), %s113_s17, 4294963200  ;;  %p12_p0 = scmp.ge.s32.totalorder %s275_s11, 5   ;;  %s385_s8 = smov %s236_s9 }
  0x38   : > { %s386_s9 = smov %s284_s14  ;;  %s387_s10 = smov %s275_s11 }
  0x39   :  { %14 = sbr.rel (!%p12_p0) target bundleno = 5 (0x5), region = 44 }
  0x40   :  { %118 = vsyncpa [#allocation5], 1 }
  0x41   :  { %120 = vsyncpa [#allocation5 + $0x1], 1 }

</bundles_post_ra>
